<compile_context>
chip_gen: v5e
topology: v5e:2x2
jax: 0.10.0
libtpu: 0.0.40
codegen_flags: <defaults>
</compile_context>

<pallas_src>
import numpy as np
import jax
import jax.numpy as jnp
from jax.experimental import pallas as pl
from jax.experimental.pallas import tpu as pltpu

EPS = 1e-5  # RevIN eps


# ---------------------------------------------------------------------------
# Pallas kernel: per-column stats -> folded affine map (RevIN folded in)
# ---------------------------------------------------------------------------
def _arima_kernel(x_ref, at_ref, comp_ref, bias_ref, o_ref):
    x = x_ref[...].astype(jnp.float32)                        # [L, Nt] (time on sublanes, (b,c) on lanes)

    # RevIN statistics (affine=False): per-column mean / population std over time.
    mean = jnp.mean(x, axis=0, keepdims=True)                 # [1, Nt]
    var = jnp.mean((x - mean) ** 2, axis=0, keepdims=True)    # unbiased=False
    std = jnp.sqrt(var + EPS)                                 # [1, Nt]

    # Whole model (decomp + differencing + linears + inverse diff) folded into
    # A^T; RevIN norm/denorm folded algebraically:
    #   o = A^T @ x + (1 - rowsum(A^T)) * mean + bias * std
    out = jnp.dot(at_ref[...], x, preferred_element_type=jnp.float32)   # [P, Nt]
    out = out + comp_ref[...] * mean + bias_ref[...] * std

    o_ref[...] = out.astype(o_ref.dtype)


# ---------------------------------------------------------------------------
# Offline fold of the post-normalization affine chain (NumPy, float64)
# ---------------------------------------------------------------------------
def _per_row_forward(xn, kernel_size, d, pred_len, w_seas, b_seas, w_trend, b_trend):
    """Post-normalization forward applied independently to each row [N, L] -> [N, P]."""
    n_rows, seq_len = xn.shape
    half = (kernel_size - 1) // 2

    # series_decomp (edge-replicated moving average)
    xp = np.concatenate(
        [np.repeat(xn[:, :1], half, axis=1), xn, np.repeat(xn[:, -1:], half, axis=1)], axis=1)
    trend = np.stack([xp[:, t:t + kernel_size].mean(axis=1) for t in range(seq_len)], axis=1)
    seasonal = xn - trend

    # seasonal branch
    seas_out = seasonal @ w_seas.T + b_seas

    # trend branch: d-order differencing -> Linear -> inverse differencing
    diff = trend.copy()
    for _ in range(d):
        diff = np.concatenate([diff[:, :1], diff[:, 1:] - diff[:, :-1]], axis=1)
    fc = diff @ w_trend.T + b_trend
    for _ in range(d):
        fc = np.concatenate([trend, trend[:, -1:] + np.cumsum(fc, axis=1)], axis=1)
    fc = fc[:, -pred_len:]

    return fc + seas_out


def build_affine_fold(seq_len, pred_len, kernel_size, d, w_seas, b_seas, w_trend, b_trend):
    """Return (A^T [P,L], comp [P,1] = 1 - rowsum(A^T), bias [P,1]) so that for a
    normalized series xn:  out_norm = A^T @ xn + bias, and for the raw series x:
    out = A^T @ x + comp * mean + bias * std."""
    probe = np.concatenate(
        [np.eye(seq_len, dtype=np.float64), np.zeros((1, seq_len), dtype=np.float64)], axis=0)
    y = _per_row_forward(probe, kernel_size, d, pred_len,
                         w_seas.astype(np.float64), b_seas.astype(np.float64),
                         w_trend.astype(np.float64), b_trend.astype(np.float64))
    bias = y[-1]                                   # image of the zero series
    a_mat = y[:-1] - bias[None, :]                 # [L, P]
    a_t = a_mat.T                                  # [P, L]
    comp = 1.0 - a_t.sum(axis=1, keepdims=True)    # [P, 1]
    return (a_t.astype(np.float32),
            comp.astype(np.float32),
            bias.reshape(pred_len, 1).astype(np.float32))


# ---------------------------------------------------------------------------
# Wrapper: lane-dense repack + pallas_call
# ---------------------------------------------------------------------------
def _round_up(n, m):
    return ((n + m - 1) // m) * m


def arima_forecast(x_enc, a_t, comp, bias):
    """x_enc: [B, seq_len, C] -> [B, pred_len, C] (matches Model.forward for 'forecast')."""
    batch, seq_len, channels = x_enc.shape
    pred_len = a_t.shape[0]
    n_cols = batch * channels

    # Repack so (batch, channel) pairs live on lanes: [B, L, C] -> [L, B*C].
    x2d = jnp.transpose(x_enc, (1, 0, 2)).reshape(seq_len, n_cols)

    # Lane tile: multiple of 128, capped at 1024 to keep double-buffered VMEM small.
    n_tile = min(1024, _round_up(n_cols, 128))
    n_pad = _round_up(n_cols, n_tile)
    if n_pad != n_cols:
        # Zero padding is harmless: the fold never divides by std, padded columns
        # are sliced off below.
        x2d = jnp.pad(x2d, ((0, 0), (0, n_pad - n_cols)))

    grid = (n_pad // n_tile,)

    o2d = pl.pallas_call(
        _arima_kernel,
        out_shape=jax.ShapeDtypeStruct((pred_len, n_pad), x_enc.dtype),
        grid=grid,
        in_specs=[
            pl.BlockSpec((seq_len, n_tile), lambda n: (0, n)),   # x (streamed, native dtype)
            pl.BlockSpec((pred_len, seq_len), lambda n: (0, 0)),  # folded A^T (resident)
            pl.BlockSpec((pred_len, 1), lambda n: (0, 0)),        # 1 - rowsum(A^T) (resident)
            pl.BlockSpec((pred_len, 1), lambda n: (0, 0)),        # folded bias (resident)
        ],
        out_specs=pl.BlockSpec((pred_len, n_tile), lambda n: (0, n)),
        compiler_params=pltpu.CompilerParams(
            dimension_semantics=("parallel",)),
    )(x2d, a_t, comp, bias)

    # [P, B*C] -> [B, P, C]
    return jnp.transpose(o2d[:, :n_cols].reshape(pred_len, batch, channels), (1, 0, 2))


# ---------------------------------------------------------------------------
# Pure NumPy reference mirroring the PyTorch forward, for verification.
# ---------------------------------------------------------------------------
def reference_forward(x_enc, kernel_size, d, pred_len, w_seas, b_seas, w_trend, b_trend):
    x = np.asarray(x_enc, dtype=np.float64)
    _, seq_len, _ = x.shape
    mean = x.mean(axis=1, keepdims=True)
    stdev = np.sqrt(x.var(axis=1, keepdims=True) + EPS)
    xn = (x - mean) / stdev                                               # RevIN norm (affine=False)
    half = (kernel_size - 1) // 2
    xp = np.concatenate([np.repeat(xn[:, :1, :], half, axis=1), xn,
                         np.repeat(xn[:, -1:, :], half, axis=1)], axis=1)
    trend = np.stack([xp[:, t:t + kernel_size, :].mean(axis=1) for t in range(seq_len)], axis=1)
    seasonal = (xn - trend).transpose(0, 2, 1)                            # [B, C, L]
    trend = trend.transpose(0, 2, 1)
    seas_out = seasonal @ w_seas.T + b_seas
    diff = trend.copy()
    for _ in range(d):
        diff = np.concatenate([diff[:, :, :1], diff[:, :, 1:] - diff[:, :, :-1]], axis=2)
    fc = diff @ w_trend.T + b_trend
    for _ in range(d):
        fc = np.concatenate([trend, trend[:, :, -1:] + np.cumsum(fc, axis=2)], axis=2)
    fc = fc[:, :, -pred_len:]
    out = (fc + seas_out).transpose(0, 2, 1)                              # [B, P, C]
    return (out * stdev + mean).astype(np.float32)                        # RevIN denorm


# ---------------------------------------------------------------------------
if __name__ == "__main__":
    B, C, L, P = 2, 4, 16, 8          # batch, enc_in, seq_len, pred_len
    kernel_size = 5                   # configs.moving_avg (odd)

    key = jax.random.PRNGKey(0)
    k1, k2, k3, k4, k5 = jax.random.split(key, 5)
    x_enc = jax.random.normal(k1, (B, L, C), dtype=jnp.float32)

    # nn.Linear-style deterministic init
    bound = 1.0 / np.sqrt(L)
    W_seas = np.asarray(jax.random.uniform(k2, (P, L), jnp.float32, -bound, bound))
    b_seas = np.asarray(jax.random.uniform(k3, (P,), jnp.float32, -bound, bound))
    W_trend = np.asarray(jax.random.uniform(k4, (P, L), jnp.float32, -bound, bound))
    b_trend = np.asarray(jax.random.uniform(k5, (P,), jnp.float32, -bound, bound))

    forecast_fn = jax.jit(arima_forecast)

    # Test both d=1 (default config) and d=2 (exercises the inverse-diff fold).
    for d_order in (1, 2):
        a_t, comp, bias = build_affine_fold(L, P, kernel_size, d_order,
                                            W_seas, b_seas, W_trend, b_trend)
        out = forecast_fn(x_enc, jnp.asarray(a_t), jnp.asarray(comp), jnp.asarray(bias))
        out = jax.block_until_ready(out)

        ref = reference_forward(np.asarray(x_enc), kernel_size, d_order, P,
                                W_seas, b_seas, W_trend, b_trend)
        assert out.shape == (B, P, C)
        np.testing.assert_allclose(np.asarray(out), ref, rtol=3e-3, atol=3e-3)

    print("KERNEL_OK")
</pallas_src>

<mosaic_0001>
module attributes {stable_mosaic.version = 11 : i64} {
  func.func @_arima_kernel(%arg0: i32, %arg1: memref<16x128xf32, #tpu.memory_space<vmem>>, %arg2: memref<8x16xf32, #tpu.memory_space<vmem>>, %arg3: memref<8x1xf32, #tpu.memory_space<vmem>>, %arg4: memref<8x1xf32, #tpu.memory_space<vmem>>, %arg5: memref<8x128xf32, #tpu.memory_space<vmem>>) attributes {dimension_semantics = [#tpu.dimension_semantics<parallel>], iteration_bounds = array<i64: 1>, scalar_prefetch = 0 : i64, scratch_operands = 0 : i64, tpu.core_type = #tpu.core_type<tc>, window_params = [{transform_indices = @transform_0, window_bounds = array<i64: 16, 128>}, {pipeline_mode = #tpu.pipeline_mode<synchronous>, transform_indices = @transform_1, window_bounds = array<i64: 8, 16>}, {pipeline_mode = #tpu.pipeline_mode<synchronous>, transform_indices = @transform_2, window_bounds = array<i64: 8, 1>}, {pipeline_mode = #tpu.pipeline_mode<synchronous>, transform_indices = @transform_3, window_bounds = array<i64: 8, 1>}, {transform_indices = @transform_4, window_bounds = array<i64: 8, 128>}]} {
    %c0 = arith.constant 0 : index
    %c0_0 = arith.constant 0 : index
    %0 = vector.load %arg1[%c0, %c0_0] : memref<16x128xf32, #tpu.memory_space<vmem>>, vector<16x128xf32>
    %cst = arith.constant dense<0.000000e+00> : vector<128xf32>
    %1 = vector.multi_reduction <add>, %0, %cst [0] : vector<16x128xf32> to vector<128xf32>
    %2 = vector.shape_cast %1 : vector<128xf32> to vector<1x128xf32>
    %cst_1 = arith.constant 1.600000e+01 : f32
    %3 = vector.broadcast %cst_1 : f32 to vector<1x128xf32>
    %4 = arith.divf %2, %3 : vector<1x128xf32>
    %5 = vector.broadcast %4 : vector<1x128xf32> to vector<16x128xf32>
    %6 = arith.subf %0, %5 : vector<16x128xf32>
    %7 = arith.mulf %6, %6 : vector<16x128xf32>
    %cst_2 = arith.constant dense<0.000000e+00> : vector<128xf32>
    %8 = vector.multi_reduction <add>, %7, %cst_2 [0] : vector<16x128xf32> to vector<128xf32>
    %9 = vector.shape_cast %8 : vector<128xf32> to vector<1x128xf32>
    %cst_3 = arith.constant 1.600000e+01 : f32
    %10 = vector.broadcast %cst_3 : f32 to vector<1x128xf32>
    %11 = arith.divf %9, %10 : vector<1x128xf32>
    %cst_4 = arith.constant 9.99999974E-6 : f32
    %12 = vector.broadcast %cst_4 : f32 to vector<1x128xf32>
    %13 = arith.addf %11, %12 : vector<1x128xf32>
    %14 = math.sqrt %13 : vector<1x128xf32>
    %c0_5 = arith.constant 0 : index
    %c0_6 = arith.constant 0 : index
    %15 = vector.load %arg2[%c0_5, %c0_6] : memref<8x16xf32, #tpu.memory_space<vmem>>, vector<8x16xf32>
    %cst_7 = arith.constant dense<0.000000e+00> : vector<8x128xf32>
    %16 = tpu.matmul %15, %0, %cst_7 {dimension_numbers = #tpu.dot_dimension_numbers<[1], [0], [0], [1], [0, 0, 1, 1], [], []>} : vector<8x16xf32>, vector<16x128xf32>, vector<8x128xf32> -> vector<8x128xf32>
    %c0_8 = arith.constant 0 : index
    %c0_9 = arith.constant 0 : index
    %17 = vector.load %arg3[%c0_8, %c0_9] : memref<8x1xf32, #tpu.memory_space<vmem>>, vector<8x1xf32>
    %18 = vector.broadcast %17 : vector<8x1xf32> to vector<8x128xf32>
    %19 = vector.broadcast %4 : vector<1x128xf32> to vector<8x128xf32>
    %20 = arith.mulf %18, %19 : vector<8x128xf32>
    %21 = arith.addf %16, %20 : vector<8x128xf32>
    %c0_10 = arith.constant 0 : index
    %c0_11 = arith.constant 0 : index
    %22 = vector.load %arg4[%c0_10, %c0_11] : memref<8x1xf32, #tpu.memory_space<vmem>>, vector<8x1xf32>
    %23 = vector.broadcast %22 : vector<8x1xf32> to vector<8x128xf32>
    %24 = vector.broadcast %14 : vector<1x128xf32> to vector<8x128xf32>
    %25 = arith.mulf %23, %24 : vector<8x128xf32>
    %26 = arith.addf %21, %25 : vector<8x128xf32>
    %c0_12 = arith.constant 0 : index
    %c0_13 = arith.constant 0 : index
    %27 = vector.load %arg5[%c0_12, %c0_13] : memref<8x128xf32, #tpu.memory_space<vmem>>, vector<8x128xf32>
    tpu.vector_store %arg5[%c0_12, %c0_13], %26 {strides = array<i32>} : memref<8x128xf32, #tpu.memory_space<vmem>>, vector<8x128xf32>,
    return
  }
  func.func @transform_0(%arg0: i32) -> (i32, i32) {
    %c0_i32 = arith.constant 0 : i32
    %c0_i32_0 = arith.constant 0 : i32
    return %c0_i32, %arg0 : i32, i32
  }
  func.func @transform_1(%arg0: i32) -> (i32, i32) {
    %c0_i32 = arith.constant 0 : i32
    %c0_i32_0 = arith.constant 0 : i32
    %c0_i32_1 = arith.constant 0 : i32
    return %c0_i32, %c0_i32_0 : i32, i32
  }
  func.func @transform_2(%arg0: i32) -> (i32, i32) {
    %c0_i32 = arith.constant 0 : i32
    %c0_i32_0 = arith.constant 0 : i32
    %c0_i32_1 = arith.constant 0 : i32
    return %c0_i32, %c0_i32_0 : i32, i32
  }
  func.func @transform_3(%arg0: i32) -> (i32, i32) {
    %c0_i32 = arith.constant 0 : i32
    %c0_i32_0 = arith.constant 0 : i32
    %c0_i32_1 = arith.constant 0 : i32
    return %c0_i32, %c0_i32_0 : i32, i32
  }
  func.func @transform_4(%arg0: i32) -> (i32, i32) {
    %c0_i32 = arith.constant 0 : i32
    %c0_i32_0 = arith.constant 0 : i32
    return %c0_i32, %arg0 : i32, i32
  }
}

</mosaic_0001>

<bundles_post_ra>
// kernel: arima_forecast.1
= control target key start
LH: loop header
LB: loop body
LE: loop exit
PB: predicated region body
PF: predicated region fallthrough
CT: control target
= control target key end

     0   :  { %v112_v0 = vmov 0   ;;  %v113_v4 = vmov 16.0   ;;  %vm67_vm0 = vcmask 130048   ;;  %s157_s2 = inlined_call_operand.vmem [shape: f32[8,1], index: 2, kind: input, shape index: {}]   ;;  %s158_s0 = inlined_call_operand.vmem [shape: f32[16,128], index: 0, kind: input, shape index: {}]   ;;  %s159_s1 = inlined_call_operand.vmem [shape: f32[8,16], index: 1, kind: input, shape index: {}]   ;;  %s160_s3 = inlined_call_operand.vmem [shape: f32[8,1], index: 3, kind: input, shape index: {}]   ;;  %s161_s4 = inlined_call_operand.vmem [shape: f32[8,128], index: 4, kind: output, shape index: {}]  }
   0x1   :  { %107 = vset.pattern.permute.xlu0 %v112_v0  ;;  %v60_v1 = vld [vmem:[%s157_s2] sm:$0xff]  ;;  %v18_v2 = vld [vmem:[%s158_s0 + $0x8] sm:$0xff]  ;;  %108 = vrcp.f32 %v113_v4 }
   0x2   :  { %v17_v3 = vld [vmem:[%s158_s0] sm:$0xff]  ;;  %63 = vperm.xlu0 %107, %v60_v1   ;;  %85 = vmatpush.msra.mxu0 %v18_v2 }
   0x3   :  { %v19_v5 = vadd.f32 %v18_v2, %v17_v3  ;;  %v59_v6 = vld [vmem:[%s159_s1] sm:$0xff] }
   0x4   :  { %86 = vmatpush.msra.mxu0 %v17_v3  ;;  %v91_v10 = vld [vmem:[%s160_s3] sm:$0xff] }
   0x5   :  { %v20_v7 = vrot.slane %v19_v5, 4  ;;  %104 = vmatmul.msk.f32.vlgmr.msra.gmra.mxu0 %vm67_vm0, %v59_v6 }
   0x7   :  { %v21_v8 = vadd.f32 %v20_v7, %v19_v5  ;;  %v109_v9 = vpop.eup %108 }
   0x8   :  { %v27_v12 = vmul.f32 16.0, %v109_v9  ;;  %vm31_vm1 = vweird.f32 %v109_v9 }
   0x9   :  { %v22_v11 = vrot.slane %v21_v8, 2 }
   0xa   :  { %v28_v14 = vsub.f32 1.0, %v27_v12  ;;  %94 = vperm.xlu0 %107, %v91_v10  }
   0xb   :  { %v23_v13 = vadd.f32 %v22_v11, %v21_v8 }
   0xc   :  { %v29_v16 = vmul.f32 %v109_v9, %v28_v14 }
   0xd   :  { %v24_v15 = vrot.slane %v23_v13, 1 }
   0xe   :  { %v30_v18 = vadd.f32 %v109_v9, %v29_v16 }
   0xf   :  { %v25_v17 = vadd.f32 %v24_v15, %v23_v13 }
  0x10   :  { %v32_v19 = vsel %vm31_vm1, %v109_v9, %v30_v18 }
  0x11   :  { %v33_v20 = vmul.f32 %v32_v19, %v25_v17 }
  0x13   :  { %v34_v21 = vsub.f32 %v17_v3, %v33_v20  ;;  %v35_v22 = vsub.f32 %v18_v2, %v33_v20 }
  0x15   :  { %v36_v23 = vmul.f32 %v34_v21, %v34_v21  ;;  %v37_v24 = vmul.f32 %v35_v22, %v35_v22 }
  0x17   :  { %v38_v25 = vadd.f32 %v37_v24, %v36_v23 }
  0x19   :  { %v39_v26 = vrot.slane %v38_v25, 4 }
  0x1b   :  { %v40_v27 = vadd.f32 %v39_v26, %v38_v25 }
  0x1d   :  { %v41_v28 = vrot.slane %v40_v27, 2 }
  0x1f   :  { %v42_v29 = vadd.f32 %v41_v28, %v40_v27 }
  0x21   :  { %v43_v30 = vrot.slane %v42_v29, 1 }
  0x23   :  { %v44_v31 = vadd.f32 %v43_v30, %v42_v29 }
  0x25   :  { %v45_v32 = vmul.f32 %v44_v31, %v32_v19 }
  0x27   :  { %v46_v33 = vadd.f32 1e-05, %v45_v32 }
  0x29   :  { %110 = vrsqrt.f32 %v46_v33  ;;  %vm54_vm2 = vcmp.eq.f32.partialorder %v46_v33, inf  ;;  %v57_v42 = vand.u32 2147483648, %v46_v33  ;;  %vm56_vm3 = vcmp.eq.f32.partialorder %v46_v33, 0.0 }
  0x2f   :  { %v111_v34 = vpop.eup %110 }
  0x30   :  { %v48_v35 = vmul.f32 %v111_v34, %v46_v33 }
  0x32   :  { %v49_v36 = vmul.f32 %v111_v34, %v48_v35 }
  0x34   :  { %v50_v37 = vmul.f32 0.5, %v49_v36 }
  0x36   :  { %v51_v38 = vsub.f32 1.5, %v50_v37 }
  0x38   :  { %v52_v39 = vmul.f32 %v111_v34, %v51_v38 }
  0x3a   :  { %v53_v41 = vmul.f32 %v52_v39, %v46_v33 }
  0x3c   :  { %v55_v43 = vsel %vm54_vm2, %v46_v33, %v53_v41 }
  0x3d   :  { %v58_v45 = vsel %vm56_vm3, %v57_v42, %v55_v43 }
  0x74   :  { %v64_v40 = vpop.permute.xlu0 %63 }
  0x75   :  { %v66_v46 = vmul.f32 %v64_v40, %v33_v20 }
  0x7c   :  { %v95_v44 = vpop.permute.xlu0 %94 }
  0x7d   :  { %v97_v48 = vmul.f32 %v95_v44, %v58_v45 }
  0x82   :  { %v88_v47 = vpop.f32.mrf.mxu0 }
  0x83   :  { %v89_v49 = vadd.f32 %v88_v47, %v66_v46 }
  0x85   :  { %v98_v50 = vadd.f32 %v97_v48, %v89_v49 }
  0x87   :  { %99 = vst [vmem:[%s161_s4] sm:$0xff] %v98_v50 }

</bundles_post_ra>
